<compile_context>
chip_gen: v7x
topology: tpu7x:2x2x1
jax: 0.10.0
libtpu: 0.0.40
codegen_flags: <defaults>
</compile_context>

<pallas_src>
import jax
import jax.numpy as jnp
from jax.experimental import pallas as pl
from jax.experimental.pallas import tpu as pltpu

LN_EPS = 1e-5


def _round_up(a: int, m: int) -> int:
    return ((a + m - 1) // m) * m


def sublayer_kernel(x_ref, w_ref, b_ref, gamma_ref, beta_ref, o_ref, y_ref):
    # x_ref:     (tm, H)   input rows (resident across the column axis j)
    # w_ref:     (H, tn)   pre-transposed Linear weight slab (in, out) layout
    # b_ref:     (1, tn)   Linear bias columns (f32)
    # gamma_ref: (1, H)    LayerNorm weight (f32, resident)
    # beta_ref:  (1, H)    LayerNorm bias   (f32, resident)
    # o_ref:     (tm, tn)  output tile
    # y_ref:     (tm, H)   VMEM scratch: cached LayerNorm output (compute dtype)
    tn = o_ref.shape[-1]
    j = pl.program_id(1)

    # --- LayerNorm: computed once per row tile (j == 0), cached for j > 0 ---
    @pl.when(j == 0)
    def _():
        x = x_ref[...].astype(jnp.float32)
        mean = jnp.mean(x, axis=-1, keepdims=True)
        centered = x - mean
        # Two-pass (centered, biased) variance kept for numerical robustness
        # (matches torch LayerNorm); it now only runs once per row tile, so
        # the extra XLU reduction is off the per-column critical path.
        var = jnp.mean(centered * centered, axis=-1, keepdims=True)
        y = centered * jax.lax.rsqrt(var + LN_EPS)
        y = y * gamma_ref[...] + beta_ref[...]
        y_ref[...] = y.astype(y_ref.dtype)

    # --- Linear sublayer on this column slab: y @ W_t[:, cols] + b ---
    # Weight pre-transposed in the wrapper -> contraction dim is on the RHS
    # sublane axis, straight MXU matmul (bf16 native path when compute dtype
    # is bf16) with f32 accumulation.
    z = jnp.dot(y_ref[...], w_ref[...], preferred_element_type=jnp.float32)
    z = z + b_ref[...]

    # TODO(synk): dropout is identity at inference; training-mode dropout
    # would build a keep-mask via pltpu.prng_seed + pltpu.prng_random_bits.

    # --- Residual: read only the needed (pre-norm) x columns ---
    col = pl.multiple_of(j * tn, tn)
    x_res = x_ref[:, pl.ds(col, tn)].astype(jnp.float32)
    o_ref[...] = (x_res + z).astype(o_ref.dtype)


def _tile_footprint(tm, tn, H, x_bytes, c_bytes, o_bytes):
    """Rough per-core VMEM footprint of the pipelined kernel (bytes)."""
    x_buf = 2 * tm * H * x_bytes          # double-buffered x rows
    w_buf = 2 * H * tn * c_bytes          # double-buffered weight slab
    y_buf = tm * H * c_bytes              # LayerNorm cache scratch
    o_buf = 2 * tm * tn * o_bytes         # double-buffered output tile
    ln_tmp = tm * H * 4                   # f32 temporaries while LN runs
    small = 4 * H * 4 + 2 * tn * 4        # gamma / beta / bias (negligible)
    return x_buf + w_buf + y_buf + o_buf + ln_tmp + small


def _select_tiles(M, H, sub, x_bytes, c_bytes, o_bytes, budget,
                  tm_user, tn_user, x_is_bf16):
    def clamp_tm(t):
        return max(sub, min(_round_up(t, sub), _round_up(M, sub)))

    if tm_user is not None and tn_user is not None:
        return clamp_tm(tm_user), tn_user

    if tn_user is not None:
        tn_cands = [tn_user]
    else:
        # Resident full weight first (DMA'd once), then 128-aligned slabs.
        tn_cands = [H] + [c for c in (512, 256, 128) if H % c == 0 and c < H]

    tm_cap = 1024 if x_is_bf16 else 512
    if tm_user is not None:
        tm_cands = [clamp_tm(tm_user)]
    else:
        tm_cands = sorted({clamp_tm(t) for t in (1024, 512, 256, 128, 64, 32, 16, 8)
                           if t <= tm_cap}, reverse=True)

    best = None
    for tn_c in tn_cands:
        for tm_c in tm_cands:                       # largest rows first
            if _tile_footprint(tm_c, tn_c, H, x_bytes, c_bytes, o_bytes) <= budget:
                cand = (tm_c, tn_c)
                # Only accept the resident-weight variant with a reasonably
                # large row tile; otherwise column tiling + big tm wins on
                # HBM traffic.
                if (tn_c == H and tn_user is None and len(tn_cands) > 1
                        and tm_c < min(256, _round_up(M, sub))):
                    if best is None:
                        best = cand
                    break
                return cand
    if best is not None:
        return best
    # Last resort: smallest candidates; the compiler reports if it still OOMs.
    return tm_cands[-1], tn_cands[-1]


def sublayer_connection(x, w, b, gamma, beta, *, tm=None, tn=None,
                        compute_dtype=jnp.bfloat16, vmem_limit_bytes=None):
    """Pre-norm residual block: x + Linear(LayerNorm(x)); dropout = identity.

    x: (B, S, H); w: (H, H) torch-style (out_features, in_features);
    b, gamma, beta: (H,).  compute_dtype is the MXU input dtype (bf16 default).
    """
    B, S, H = x.shape
    M = B * S

    # --- per-generation VMEM budget -------------------------------------
    try:
        vmem_cap = int(pltpu.get_tpu_info().vmem_capacity_bytes)
    except Exception:
        vmem_cap = 128 * 1024 * 1024
    if vmem_limit_bytes is None:
        # v5e/v6e (128 MiB physical) -> ~96 MiB; v7x (64 MiB physical) -> ~48
        # MiB.  Never the full physical VMEM: pipelining + compiler scratch
        # need headroom.
        vmem_limit_bytes = min((vmem_cap * 3) // 4, 100 * 1024 * 1024)
    budget = int(vmem_limit_bytes * 0.85)

    sub = 16 if x.dtype == jnp.bfloat16 else 8
    x_bytes = jnp.dtype(x.dtype).itemsize
    c_bytes = jnp.dtype(compute_dtype).itemsize

    tm, tn = _select_tiles(M, H, sub, x_bytes, c_bytes, x_bytes, budget,
                           tm, tn, x.dtype == jnp.bfloat16)
    assert tn == H or (H % tn == 0 and tn % 128 == 0), \
        "tn must divide H and be a multiple of 128 (or equal H)"

    # Keep >= 2 row tiles so megacore / v7x's two TensorCores both get work.
    if M > 2 * sub and _round_up(M, tm) // tm < 2:
        tm = _round_up((M + 1) // 2, sub)

    M_pad = _round_up(M, tm)
    x2 = x.reshape(M, H)
    if M_pad != M:
        x2 = jnp.pad(x2, ((0, M_pad - M), (0, 0)))

    # One-time wrapper-side parameter prep (amortized over the whole kernel):
    #  * weight pre-transposed to (in, out) -> no per-step XLU transpose,
    #  * weight cast once to the MXU compute dtype (bf16 native path),
    #  * bias / gamma / beta pre-cast to f32 once (no per-step VALU casts).
    w_t = w.T.astype(compute_dtype)                       # (H_in, H_out)
    b2 = b.reshape(1, H).astype(jnp.float32)
    g2 = gamma.reshape(1, H).astype(jnp.float32)
    bt2 = beta.reshape(1, H).astype(jnp.float32)

    grid = (M_pad // tm, H // tn)

    out2 = pl.pallas_call(
        sublayer_kernel,
        out_shape=jax.ShapeDtypeStruct((M_pad, H), x.dtype),
        grid=grid,
        in_specs=[
            pl.BlockSpec((tm, H), lambda i, j: (i, 0)),   # x rows (resident over j)
            pl.BlockSpec((H, tn), lambda i, j: (0, j)),   # weight slab (in, out);
                                                          # constant index when
                                                          # tn == H -> DMA'd once
            pl.BlockSpec((1, tn), lambda i, j: (0, j)),   # bias columns
            pl.BlockSpec((1, H), lambda i, j: (0, 0)),    # gamma (resident)
            pl.BlockSpec((1, H), lambda i, j: (0, 0)),    # beta  (resident)
        ],
        out_specs=pl.BlockSpec((tm, tn), lambda i, j: (i, j)),
        scratch_shapes=[pltpu.VMEM((tm, H), compute_dtype)],   # cached LN output
        compiler_params=pltpu.CompilerParams(
            # j carries the LN cache in scratch -> must be "arbitrary";
            # i stays "parallel" for megacore / v7x 2-TC sharding.
            dimension_semantics=("parallel", "arbitrary"),
            vmem_limit_bytes=int(vmem_limit_bytes)),
    )(x2, w_t, b2, g2, bt2)

    if M_pad != M:
        out2 = out2[:M]
    return out2.reshape(B, S, H)


def reference(x, w, b, gamma, beta):
    xf = x.astype(jnp.float32)
    mean = jnp.mean(xf, axis=-1, keepdims=True)
    var = jnp.mean((xf - mean) ** 2, axis=-1, keepdims=True)
    xn = (xf - mean) / jnp.sqrt(var + LN_EPS)
    y = xn * gamma.astype(jnp.float32) + beta.astype(jnp.float32)
    z = y @ w.astype(jnp.float32).T + b.astype(jnp.float32)
    return (xf + z).astype(x.dtype)


if __name__ == "__main__":
    # Small but lane-aligned demo sizes (H a multiple of 128 so the demo
    # exercises full-lane stores and a real MXU contraction).
    B, S, H = 2, 64, 256
    key = jax.random.PRNGKey(0)
    kx, kw, kb = jax.random.split(key, 3)

    x = jax.random.normal(kx, (B, S, H), dtype=jnp.float32)

    # Deterministic parameter init (synthetic, not a checkpoint load).
    bound = 1.0 / (H ** 0.5)
    w = jax.random.uniform(kw, (H, H), jnp.float32, -bound, bound)   # (out, in)
    b = jax.random.uniform(kb, (H,), jnp.float32, -bound, bound)
    gamma = jnp.ones((H,), jnp.float32)
    beta = jnp.zeros((H,), jnp.float32)

    ref = reference(x, w, b, gamma, beta)

    # 1) Default path: bf16 MXU compute, auto tile selection (resident weight,
    #    >=2 row tiles).  bf16 tolerance.
    out = jax.block_until_ready(sublayer_connection(x, w, b, gamma, beta))
    assert out.shape == (B, S, H)
    assert jnp.allclose(out, ref, atol=5e-2, rtol=5e-2), "bf16 path mismatch"

    # 2) Full-precision compute path: tight tolerance vs the f32 reference.
    out_f32 = jax.block_until_ready(
        sublayer_connection(x, w, b, gamma, beta, compute_dtype=jnp.float32))
    assert jnp.allclose(out_f32, ref, atol=1e-4, rtol=1e-4), "f32 path mismatch"

    # 3) Forced column tiling (2x2 grid) to exercise the cached-LN j>0 path.
    out_ct = jax.block_until_ready(
        sublayer_connection(x, w, b, gamma, beta, tm=64, tn=128,
                            compute_dtype=jnp.float32))
    assert jnp.allclose(out_ct, ref, atol=1e-4, rtol=1e-4), "column-tiled mismatch"

    # 4) Ragged row count (exercises the padding path).
    xr = jax.random.normal(kx, (2, 50, H), dtype=jnp.float32)
    out_r = jax.block_until_ready(
        sublayer_connection(xr, w, b, gamma, beta, compute_dtype=jnp.float32))
    assert jnp.allclose(out_r, reference(xr, w, b, gamma, beta),
                        atol=1e-4, rtol=1e-4), "ragged mismatch"

    print("KERNEL_OK")
</pallas_src>

<mosaic_0001>
module attributes {stable_mosaic.version = 11 : i64} {
  func.func @sublayer_kernel(%arg0: i32, %arg1: i32, %arg2: memref<64x256xf32, #tpu.memory_space<vmem>>, %arg3: memref<256x256xbf16, #tpu.memory_space<vmem>>, %arg4: memref<1x256xf32, #tpu.memory_space<vmem>>, %arg5: memref<1x256xf32, #tpu.memory_space<vmem>>, %arg6: memref<1x256xf32, #tpu.memory_space<vmem>>, %arg7: memref<64x256xf32, #tpu.memory_space<vmem>>, %arg8: memref<64x256xbf16, #tpu.memory_space<vmem>>) attributes {dimension_semantics = [#tpu.dimension_semantics<parallel>, #tpu.dimension_semantics<arbitrary>], iteration_bounds = array<i64: 2, 1>, scalar_prefetch = 0 : i64, scratch_operands = 1 : i64, tpu.core_type = #tpu.core_type<tc>, window_params = [{transform_indices = @transform_0, window_bounds = array<i64: 64, 256>}, {transform_indices = @transform_1, window_bounds = array<i64: 256, 256>}, {transform_indices = @transform_2, window_bounds = array<i64: 1, 256>}, {pipeline_mode = #tpu.pipeline_mode<synchronous>, transform_indices = @transform_3, window_bounds = array<i64: 1, 256>}, {pipeline_mode = #tpu.pipeline_mode<synchronous>, transform_indices = @transform_4, window_bounds = array<i64: 1, 256>}, {transform_indices = @transform_5, window_bounds = array<i64: 64, 256>}]} {
    %c0_i32 = arith.constant 0 : i32
    %0 = arith.cmpi eq, %arg1, %c0_i32 : i32
    %1 = arith.extui %0 : i1 to i32
    %c0_i32_0 = arith.constant 0 : i32
    %2 = arith.cmpi ne, %1, %c0_i32_0 : i32
    scf.if %2 {
      %c0_9 = arith.constant 0 : index
      %c0_10 = arith.constant 0 : index
      %15 = vector.load %arg2[%c0_9, %c0_10] : memref<64x256xf32, #tpu.memory_space<vmem>>, vector<64x256xf32>
      %cst_11 = arith.constant dense<0.000000e+00> : vector<64xf32>
      %16 = vector.multi_reduction <add>, %15, %cst_11 [1] : vector<64x256xf32> to vector<64xf32>
      %17 = vector.shape_cast %16 : vector<64xf32> to vector<64x1xf32>
      %cst_12 = arith.constant 2.560000e+02 : f32
      %18 = vector.broadcast %cst_12 : f32 to vector<64x1xf32>
      %19 = arith.divf %17, %18 : vector<64x1xf32>
      %20 = vector.broadcast %19 : vector<64x1xf32> to vector<64x256xf32>
      %21 = arith.subf %15, %20 : vector<64x256xf32>
      %22 = arith.mulf %21, %21 : vector<64x256xf32>
      %cst_13 = arith.constant dense<0.000000e+00> : vector<64xf32>
      %23 = vector.multi_reduction <add>, %22, %cst_13 [1] : vector<64x256xf32> to vector<64xf32>
      %24 = vector.shape_cast %23 : vector<64xf32> to vector<64x1xf32>
      %cst_14 = arith.constant 2.560000e+02 : f32
      %25 = vector.broadcast %cst_14 : f32 to vector<64x1xf32>
      %26 = arith.divf %24, %25 : vector<64x1xf32>
      %cst_15 = arith.constant 9.99999974E-6 : f32
      %27 = vector.broadcast %cst_15 : f32 to vector<64x1xf32>
      %28 = arith.addf %26, %27 : vector<64x1xf32>
      %29 = math.rsqrt %28 : vector<64x1xf32>
      %30 = vector.broadcast %29 : vector<64x1xf32> to vector<64x256xf32>
      %31 = arith.mulf %21, %30 : vector<64x256xf32>
      %c0_16 = arith.constant 0 : index
      %c0_17 = arith.constant 0 : index
      %32 = vector.load %arg5[%c0_16, %c0_17] : memref<1x256xf32, #tpu.memory_space<vmem>>, vector<1x256xf32>
      %33 = vector.broadcast %32 : vector<1x256xf32> to vector<64x256xf32>
      %34 = arith.mulf %31, %33 : vector<64x256xf32>
      %c0_18 = arith.constant 0 : index
      %c0_19 = arith.constant 0 : index
      %35 = vector.load %arg6[%c0_18, %c0_19] : memref<1x256xf32, #tpu.memory_space<vmem>>, vector<1x256xf32>
      %36 = vector.broadcast %35 : vector<1x256xf32> to vector<64x256xf32>
      %37 = arith.addf %34, %36 : vector<64x256xf32>
      %38 = arith.truncf %37 : vector<64x256xf32> to vector<64x256xbf16>
      %c0_20 = arith.constant 0 : index
      %c0_21 = arith.constant 0 : index
      %39 = vector.load %arg8[%c0_20, %c0_21] : memref<64x256xbf16, #tpu.memory_space<vmem>>, vector<64x256xbf16>
      tpu.vector_store %arg8[%c0_20, %c0_21], %38 {strides = array<i32>} : memref<64x256xbf16, #tpu.memory_space<vmem>>, vector<64x256xbf16>,
    } else {
    }
    %c0 = arith.constant 0 : index
    %c0_1 = arith.constant 0 : index
    %3 = vector.load %arg8[%c0, %c0_1] : memref<64x256xbf16, #tpu.memory_space<vmem>>, vector<64x256xbf16>
    %c0_2 = arith.constant 0 : index
    %c0_3 = arith.constant 0 : index
    %4 = vector.load %arg3[%c0_2, %c0_3] : memref<256x256xbf16, #tpu.memory_space<vmem>>, vector<256x256xbf16>
    %cst = arith.constant dense<0.000000e+00> : vector<64x256xf32>
    %5 = tpu.matmul %3, %4, %cst {dimension_numbers = #tpu.dot_dimension_numbers<[1], [0], [0], [1], [0, 0, 1, 1], [], []>} : vector<64x256xbf16>, vector<256x256xbf16>, vector<64x256xf32> -> vector<64x256xf32>
    %c0_4 = arith.constant 0 : index
    %c0_5 = arith.constant 0 : index
    %6 = vector.load %arg4[%c0_4, %c0_5] : memref<1x256xf32, #tpu.memory_space<vmem>>, vector<1x256xf32>
    %7 = vector.broadcast %6 : vector<1x256xf32> to vector<64x256xf32>
    %8 = arith.addf %5, %7 : vector<64x256xf32>
    %c256_i32 = arith.constant 256 : i32
    %9 = arith.muli %arg1, %c256_i32 : i32
    %10 = tpu.assume_multiple %9, 256 : i32
    %c0_6 = arith.constant 0 : index
    %11 = arith.index_cast %10 : i32 to index
    %12 = vector.load %arg2[%c0_6, %11] : memref<64x256xf32, #tpu.memory_space<vmem>>, vector<64x256xf32>
    %13 = arith.addf %12, %8 : vector<64x256xf32>
    %c0_7 = arith.constant 0 : index
    %c0_8 = arith.constant 0 : index
    %14 = vector.load %arg7[%c0_7, %c0_8] : memref<64x256xf32, #tpu.memory_space<vmem>>, vector<64x256xf32>
    tpu.vector_store %arg7[%c0_7, %c0_8], %13 {strides = array<i32>} : memref<64x256xf32, #tpu.memory_space<vmem>>, vector<64x256xf32>,
    return
  }
  func.func @transform_0(%arg0: i32, %arg1: i32) -> (i32, i32) {
    %c0_i32 = arith.constant 0 : i32
    %c0_i32_0 = arith.constant 0 : i32
    return %arg0, %c0_i32 : i32, i32
  }
  func.func @transform_1(%arg0: i32, %arg1: i32) -> (i32, i32) {
    %c0_i32 = arith.constant 0 : i32
    %c0_i32_0 = arith.constant 0 : i32
    return %c0_i32, %arg1 : i32, i32
  }
  func.func @transform_2(%arg0: i32, %arg1: i32) -> (i32, i32) {
    %c0_i32 = arith.constant 0 : i32
    %c0_i32_0 = arith.constant 0 : i32
    return %c0_i32, %arg1 : i32, i32
  }
  func.func @transform_3(%arg0: i32, %arg1: i32) -> (i32, i32) {
    %c0_i32 = arith.constant 0 : i32
    %c0_i32_0 = arith.constant 0 : i32
    %c0_i32_1 = arith.constant 0 : i32
    return %c0_i32, %c0_i32_0 : i32, i32
  }
  func.func @transform_4(%arg0: i32, %arg1: i32) -> (i32, i32) {
    %c0_i32 = arith.constant 0 : i32
    %c0_i32_0 = arith.constant 0 : i32
    %c0_i32_1 = arith.constant 0 : i32
    return %c0_i32, %c0_i32_0 : i32, i32
  }
  func.func @transform_5(%arg0: i32, %arg1: i32) -> (i32, i32) {
    %c0_i32 = arith.constant 0 : i32
    return %arg0, %arg1 : i32, i32
  }
}

</mosaic_0001>

<bundles_post_ra>
// kernel: tpu_custom_call.1
= control target key start
LH: loop header
LB: loop body
LE: loop exit
PB: predicated region body
PF: predicated region fallthrough
CT: control target
= control target key end

     0   :  { %10 = vsyncpa [#allocation4], 0  ;;  %s2098_s0 = inlined_call_operand.hbm [shape: f32[128,256], index: 0, kind: input, shape index: {}]   ;;  %s2099_s1 = inlined_call_operand.hbm [shape: bf16[256,256], index: 1, kind: input, shape index: {}]   ;;  %s2100_s2 = inlined_call_operand.hbm [shape: f32[1,256], index: 2, kind: input, shape index: {}]   ;;  %s2101_s3 = inlined_call_operand.hbm [shape: f32[1,256], index: 3, kind: input, shape index: {}]   ;;  %s2102_s4 = inlined_call_operand.hbm [shape: f32[1,256], index: 4, kind: input, shape index: {}]   ;;  %s2103_s5 = inlined_call_operand.hbm [shape: f32[128,256], index: 5, kind: output, shape index: {}]  }
   0x1   :  { %12 = vsyncpa [#allocation4 + $0x1], 0 }
   0x2   :  { %13 = vsyncpa [#allocation7], 0 }
   0x3   :  { %14 = vsyncpa [#allocation10], 0 }
   0x4   :  { %15 = vsyncpa [#allocation5], 0 }
   0x5   :  { %17 = vsyncpa [#allocation5 + $0x1], 0  ;;  %s1577_s18 = smov 0   ;;  %s1579_s19 = smov 0  }
   0x6   :  { %s1581_s20 = smov 0   ;;  %s1583_s21 = smov 0  }
   0x7   :  { %s1585_s22 = smov 0   ;;  %s1587_s23 = smov 0  }
   0x8 LB: > { %2110 = sst [smem:[#allocation17_spill]] %s1513_s18  ;;  %s1035_s24 = sadd.s32 4294967295, %s1533_s23   ;;  %s1533_s23 = sphi %s1587_s23, %s23_s23   ;;  %s1529_s22 = sphi %s1585_s22, %s2133_s22   ;;  %s1525_s21 = sphi %s1583_s21, %s2132_s21   ;;  %s1521_s20 = sphi %s1581_s20, %s2131_s20   ;;  %s1517_s19 = sphi %s1579_s19, %s2130_s19   ;;  %s1513_s18 = sphi %s1577_s18, %s2129_s18  }
   0x9   : > { %s1036_s25 = sadd.s32 4294967294, %s1533_s23   ;;  %p55_p0 = scmp.ne.s32.totalorder %s1517_s19, %s1513_s18 }
   0xa   : > { %p1611_p1 = scmp.eq.s32.totalorder %s1035_s24, 0  ;;  %p1615_p2 = scmp.eq.s32.totalorder %s1035_s24, 1 }
   0xb   : > { %p181_p3 = scmp.eq.s32.totalorder %s1036_s25, 1  ;;  %p1037_p5 = scmp.ge.s32.totalorder %s1533_s23, 1 }
   0xc   : > { %s2111_s26 = scalar_select %p1611_p1, 1, 0 }
   0xd   : > { %s2112_s27 = scalar_select %p1615_p2, 1, 0 }
   0xe   : > { %p1621_p4 = por %p1611_p1, %p55_p0  ;;  %p1626_p6 = por %p181_p3, %p55_p0 }
   0xf   : > { %p188_p7 = scmp.lt.s32.totalorder %s1533_s23, 3  ;;  %s1535_s6 = smov [#allocation6]  }
  0x10   : > { %s2113_s28 = scalar_select %p1621_p4, 1, 0 }
  0x11   : > { %s2114_s29 = scalar_select %p1626_p6, 1, 0 }
  0x12   : > { %p1631_p8 = pnand %p1037_p5, %p188_p7  ;;  %s203_s7 = sshll.u32 %s1535_s6, 4  ;;  %s1635_s7 = int_to_ptr.vmem [resolvable:$true] %s203_s7 }
  0x13   : > { %2115 = sst [smem:[#allocation18_spill]] %s2114_s29  ;;  %s1536_s9 = smov [#allocation9]  }
  0x14   : > { %s2116_s30 = scalar_select %p1631_p8, 1, 0 }
  0x15   : > { %p1148_p9 = pneg %p1631_p8  ;;  %s231_s10 = sshll.u32 %s1536_s9, 4  ;;  %s1646_s10 = int_to_ptr.vmem [resolvable:$true] %s231_s10 }
  0x16   : > { %s1537_s11 = smov [#allocation8]   ;;  %s1301_s15 = scalar_lea.hbm %s2099_s1, 4096 }
  0x17   : > { %p1642_p11 = pnand %p1148_p9, %p1611_p1  ;;  %s1648_s12 = sshll.u32 %s1537_s11, 4  ;;  %s221_s12 = int_to_ptr.vmem [resolvable:$true] %s1648_s12 }
  0x18   : > { %p1302_p12 = scmp.ne.s32.totalorder %s2099_s1, %s1301_s15  ;;  %p1308_p5 = scmp.lt.u32.totalorder %s1301_s15, %s2099_s1 }
  0x19   : > { %p1658_p13 = pneg %p1642_p11 }
  0x1b   : > { %p1304_p0 = pnand %p1658_p13, %p1302_p12 }
  0x1d   : > { %p1305_p3 = pneg %p1304_p0 }
  0x1f   : > { %p1310_p7 = pnand %p1308_p5, %p1305_p3 }
  0x21   : > { %1313 = shalt.err (!%p1310_p7)
}
  0x22   : > { %s1314_s9 = scalar_lea.vmem %s1635_s7, 4096  ;;  %p1322_p1 = scmp.lt.s32.totalorder %s1635_s7, %s1635_s7 }
  0x23   : > { %p1315_p9 = scmp.ne.s32.totalorder %s1635_s7, %s1314_s9  ;;  %p1323_p4 = scmp.lt.s32.totalorder %s1314_s9, %s1314_s9 }
  0x25   : > { %p1317_p10 = pnand %p1315_p9, %p1658_p13  ;;  %p1324_p12 = por %p1323_p4, %p1322_p1 }
  0x27   : > { %p1318_p6 = pneg %p1317_p10 }
  0x29   : > { %p1325_p0 = pnand %p1324_p12, %p1318_p6 }
  0x2b   : > { %1328 = shalt.err (!%p1325_p0)
}
  0x2c   : > { %s1538_s11 = smov 128   ;;  %s1539_s13 = smov 8  }
  0x2d   : > { %1151 = dma.hbm_to_vmem [thread:$0]  (!%p1642_p11), %s2099_s1, 4096, %s1635_s7, [#allocation7], %s1538_s11, %s1538_s11, %s1539_s13  }
  0x2e   : > { %s1329_s25 = scalar_lea.hbm %s2101_s3, 32 }
  0x2f   : > { %p1330_p1 = scmp.ne.s32.totalorder %s2101_s3, %s1329_s25  ;;  %p1336_p10 = scmp.lt.u32.totalorder %s1329_s25, %s2101_s3 }
  0x31   : > { %p1332_p4 = pnand %p1330_p1, %p1658_p13 }
  0x33   : > { %p1333_p6 = pneg %p1332_p4 }
  0x35   : > { %p1338_p3 = pnand %p1336_p10, %p1333_p6 }
  0x37   : > { %1341 = shalt.err (!%p1338_p3)
}
  0x38   : > { %s1342_s7 = scalar_lea.vmem %s1646_s10, 32  ;;  %p1350_p12 = scmp.lt.s32.totalorder %s1646_s10, %s1646_s10 }
  0x39   : > { %p1343_p5 = scmp.ne.s32.totalorder %s1646_s10, %s1342_s7  ;;  %p1351_p0 = scmp.lt.s32.totalorder %s1342_s7, %s1342_s7 }
  0x3b   : > { %p1345_p7 = pnand %p1343_p5, %p1658_p13  ;;  %p1352_p1 = por %p1351_p0, %p1350_p12 }
  0x3d   : > { %p1346_p9 = pneg %p1345_p7 }
  0x3f   : > { %p1353_p4 = pnand %p1352_p1, %p1346_p9 }
  0x41   : > { %1356 = shalt.err (!%p1353_p4)
}
  0x42   : > { %1157 = dma.hbm_to_vmem [thread:$0]  (!%p1642_p11), %s2101_s3, 32, %s1646_s10, [#allocation10]  }
  0x43   : > { %s1357_s14 = scalar_lea.hbm %s2100_s2, 32 }
  0x44   : > { %p1358_p6 = scmp.ne.s32.totalorder %s2100_s2, %s1357_s14  ;;  %p1364_p5 = scmp.lt.u32.totalorder %s1357_s14, %s2100_s2 }
  0x46   : > { %p1360_p10 = pnand %p1358_p6, %p1658_p13 }
  0x48   : > { %p1361_p3 = pneg %p1360_p10 }
  0x4a   : > { %p1366_p7 = pnand %p1364_p5, %p1361_p3 }
  0x4c   : > { %1369 = shalt.err (!%p1366_p7)
}
  0x4d   : > { %s1370_s6 = scalar_lea.vmem %s221_s12, 32  ;;  %p1378_p1 = scmp.lt.s32.totalorder %s221_s12, %s221_s12 }
  0x4e   : > { %p1371_p9 = scmp.ne.s32.totalorder %s221_s12, %s1370_s6  ;;  %p1379_p4 = scmp.lt.s32.totalorder %s1370_s6, %s1370_s6 }
  0x50   : > { %p1373_p12 = pnand %p1371_p9, %p1658_p13  ;;  %p1380_p8 = por %p1379_p4, %p1378_p1 }
  0x52   : > { %p1374_p0 = pneg %p1373_p12 }
  0x54   : > { %p1381_p2 = pnand %p1380_p8, %p1374_p0 }
  0x56   : > { %1384 = shalt.err (!%p1381_p2)
}
  0x57   : > { %1154 = dma.hbm_to_vmem [thread:$0]  (!%p1642_p11), %s2100_s2, 32, %s221_s12, [#allocation7]  }
  0x58   : > { %s1540_s7 = smov [#allocation11]   ;;  %s1385_s13 = scalar_lea.hbm %s2102_s4, 32 }
  0x59   : > { %s242_s18 = sshll.u32 %s1540_s7, 4  ;;  %p1386_p6 = scmp.ne.s32.totalorder %s2102_s4, %s1385_s13  ;;  %s243_s18 = int_to_ptr.vmem [resolvable:$true] %s242_s18 }
  0x5a   : > { %p1392_p10 = scmp.lt.u32.totalorder %s1385_s13, %s2102_s4 }
  0x5b   : > { %p1388_p2 = pnand %p1386_p6, %p1658_p13 }
  0x5d   : > { %p1389_p8 = pneg %p1388_p2 }
  0x5f   : > { %p1394_p3 = pnand %p1392_p10, %p1389_p8 }
  0x61   : > { %1397 = shalt.err (!%p1394_p3)
}
  0x62   : > { %s1398_s12 = scalar_lea.vmem %s243_s18, 32  ;;  %p1406_p12 = scmp.lt.s32.totalorder %s243_s18, %s243_s18 }
  0x63   : > { %p1399_p5 = scmp.ne.s32.totalorder %s243_s18, %s1398_s12  ;;  %p1407_p0 = scmp.lt.s32.totalorder %s1398_s12, %s1398_s12 }
  0x65   : > { %p1401_p7 = pnand %p1399_p5, %p1658_p13  ;;  %p1408_p1 = por %p1407_p0, %p1406_p12 }
  0x67   : > { %p1402_p9 = pneg %p1401_p7 }
  0x69   : > { %p1409_p4 = pnand %p1408_p1, %p1402_p9 }
  0x6b   : > { %1412 = shalt.err (!%p1409_p4)
}
  0x6c   : > { %1160 = dma.hbm_to_vmem [thread:$0]  (!%p1642_p11), %s2102_s4, 32, %s243_s18, [#allocation10]  }
  0x6d   : > { %s35_s24 = sadd.s32 1, %s1529_s22  ;;  %s42_s10 = sadd.s32 1, %s1521_s20 }
  0x6e   : > { %p37_p13 = scmp.ge.s32.totalorder %s35_s24, 2  ;;  %p49_p6 = scmp.ne.s32.totalorder %s1521_s20, %s1517_s19 }
  0x6f   : > { %p50_p2 = scmp.eq.s32.totalorder %s1533_s23, 0  ;;  %p1173_p8 = scmp.lt.s32.totalorder %s1533_s23, 2 }
  0x70   : > { %s2135_s24 = smov (%p37_p13, %s35_s24), 0  ;;  %p2119_p3 = scmp.ne.s32.totalorder %s2112_s27, 0 }
  0x71   : > { %p51_p10 = por %p50_p2, %p49_p6  ;;  %s39_s9 = ssub.s32 %s1529_s22, %s2135_s24 }
  0x72   : > { %p1749_p5 = por %p2119_p3, %p49_p6  ;;  %s253_s7 = sand.u32 1, %s1521_s20  }
  0x73   : > { %p40_p7 = scmp.eq.s32.totalorder %s39_s9, 0  ;;  %s1043_s18 = sshll.u32 %s253_s7, 7 }
  0x74   : > { %s1093_s29 = sshll.u32 %s1529_s22, 11  ;;  %s257_s27 = scalar_lea.vmem [#allocation3], %s1043_s18 }
  0x75   : > { %s1758_s11 = scalar_select %p40_p7, %s1521_s20, %s42_s10  }
  0x76   : > { %s1763_s15 = scalar_lea.hbm %s2098_s0, %s1093_s29  ;;  %s265_s16 = sshll.u32 %s257_s27, 4  ;;  %s1771_s16 = int_to_ptr.vmem [resolvable:$true] %s265_s16 }
  0x77   : > { %p1767_p11 = pnand %p1173_p8, %p51_p10  ;;  %s1773_s12 = scalar_lea.sflag [#allocation4], %s253_s7 }
  0x78   : > { %s1413_s25 = scalar_lea.hbm %s1763_s15, 2048  ;;  %s1418_s9 = scalar_lea.hbm %s2098_s0, 4096 }
  0x79   : > { %p1414_p9 = scmp.ne.s32.totalorder %s1763_s15, %s1413_s25  ;;  %p1415_p12 = pneg %p1767_p11 }
  0x7a   : > { %p1419_p4 = scmp.lt.u32.totalorder %s1763_s15, %s2098_s0  ;;  %p1420_p13 = scmp.lt.u32.totalorder %s1418_s9, %s1413_s25 }
  0x7b   : > { %p1416_p0 = pnand %p1415_p12, %p1414_p9  ;;  %p1422_p2 = scmp.lt.u32.totalorder %s1413_s25, %s1763_s15 }
  0x7c   : > { %p1421_p6 = por %p1420_p13, %p1419_p4 }
  0x7d   : > { %p1417_p1 = pneg %p1416_p0 }
  0x7e   : > { %p1423_p8 = por %p1422_p2, %p1421_p6 }
  0x80   : > { %p1424_p10 = pnand %p1423_p8, %p1417_p1 }
  0x82   : > { %1427 = shalt.err (!%p1424_p10)
}
  0x83   : > { %s1428_s7 = scalar_lea.vmem %s1771_s16, 2048  ;;  %s1541_s13 = smov [#allocation3]  }
  0x84   : > { %p1429_p3 = scmp.ne.s32.totalorder %s1771_s16, %s1428_s7  ;;  %s1433_s14 = sshll.u32 %s1541_s13, 4  ;;  %s1434_s14 = int_to_ptr.vmem [resolvable:$false] %s1433_s14 }
  0x85   : > { %s1435_s27 = scalar_lea.vmem %s1434_s14, 4096  ;;  %p1436_p0 = scmp.lt.s32.totalorder %s1771_s16, %s1434_s14 }
  0x86   : > { %p1431_p7 = pnand %p1429_p3, %p1415_p12  ;;  %p1437_p4 = scmp.lt.s32.totalorder %s1435_s27, %s1428_s7 }
  0x88   : > { %p1432_p9 = pneg %p1431_p7  ;;  %p1438_p13 = por %p1437_p4, %p1436_p0 }
  0x8a   : > { %p1439_p6 = pnand %p1438_p13, %p1432_p9 }
  0x8c   : > { %1442 = shalt.err (!%p1439_p6)
}
  0x8d   : > { %s1542_s25 = smov 256   ;;  %s1543_s6 = smov 16  }
  0x8e   : > { %1164 = dma.hbm_to_vmem [thread:$0]  (!%p1767_p11), %s1763_s15, 2048, %s1771_s16, %s1773_s12, %s1542_s25, %s1542_s25, %s1543_s6  }
  0x8f   : > { %p2122_p12 = scmp.ne.s32.totalorder %s2116_s30, 0 }
  0x90   : > { %s1804_s10 = sand.u32 (!%p2122_p12), 1, %s1517_s19   ;;  %p2123_p1 = scmp.ne.s32.totalorder (!%p2122_p12), %s2113_s28, 0 }
  0x91   : > { %277 = sbr.rel (%p2122_p12) target bundleno = 727 (0x2d7), region = 40  ;;  %s1048_s9 = sshll.u32 (!%p2122_p12), %s1804_s10, 7 }
  0x92   : > { %s280_s18 = scalar_lea.sflag (!%p2122_p12), [#allocation4], %s1804_s10  ;;  %s283_s29 = scalar_lea.vmem (!%p2122_p12), [#allocation3], %s1048_s9 }
  0x98   : > { %1496 = dma.done.wait (%p2123_p1), %s280_s18, 2048  }
  0x99   : > { %1498 = vsyncadd (%p2123_p1), %s280_s18, 4294965248  ;;  %p2124_p11 = scmp.ne.s32.totalorder %s2111_s26, 0 }
  0x9b   : > { %1500 = dma.done.wait (%p2124_p11), [#allocation7], 4128  }
  0x9c   : > { %1502 = vsyncadd (%p2124_p11), [#allocation7], 4294963168 }
  0x9d   : > { %1504 = dma.done.wait (%p2124_p11), [#allocation10], 64  }
  0x9e   : > { %1506 = vsyncadd (%p2124_p11), [#allocation10], 4294967232  ;;  %v1822_v0 = vld [vmem:[%s283_s29] sm:$0xff]  ;;  %v1824_v1 = vld [vmem:[%s283_s29 + $0x8] sm:$0xff]  ;;  %s2010_s26 = scalar_lea.vmem [#allocation12], %s1048_s9  ;;  %s1095_s28 = sshll.u32 %s1525_s21, 11 }
  0x9f   : > { %v1826_v2 = vld [vmem:[%s283_s29 + $0x40] sm:$0xff]  ;;  %v351_v3 = vadd.f32 %v1824_v1, %v1822_v0  ;;  %v1830_v4 = vld [vmem:[%s283_s29 + $0x48] sm:$0xff]  ;;  %v1832_v5 = vld [vmem:[%s283_s29 + $0x10] sm:$0xff]  ;;  %s907_s30 = sshll.u32 %s2010_s26, 4  ;;  %s2043_s21 = scalar_lea.hbm %s2103_s5, %s1095_s28  ;;  %s2045_s30 = int_to_ptr.vmem [resolvable:$true] %s907_s30 }
  0xa0   : > { %v1834_v6 = vld [vmem:[%s283_s29 + $0x18] sm:$0xff]  ;;  %v363_v7 = vadd.f32 %v1830_v4, %v1826_v2  ;;  %v1838_v8 = vld [vmem:[%s283_s29 + $0x50] sm:$0xff]  ;;  %v1846_v12 = vld [vmem:[%s283_s29 + $0x20] sm:$0xff]  ;;  %s891_s17 = scalar_lea.sflag [#allocation5], %s1804_s10  ;;  %s1443_s12 = scalar_lea.vmem %s2045_s30, 2048 }
  0xa1   : > { %v1840_v9 = vld [vmem:[%s283_s29 + $0x58] sm:$0xff]  ;;  %352 = vadd.xlane.f32.xlu0 %v351_v3  ;;  %v354_v10 = vadd.f32 %v1834_v6, %v1832_v5  ;;  %v1848_v13 = vld [vmem:[%s283_s29 + $0x28] sm:$0xff]  ;;  %v1850_v14 = vld [vmem:[%s283_s29 + $0x30] sm:$0xff]  ;;  %p1444_p2 = scmp.ne.s32.totalorder %s2045_s30, %s1443_s12  ;;  %s1544_s7 = smov [#allocation12]  }
  0xa2   : > { %364 = vadd.xlane.f32.xlu1 %v363_v7  ;;  %v366_v11 = vadd.f32 %v1840_v9, %v1838_v8  ;;  %v1852_v15 = vld [vmem:[%s283_s29 + $0x38] sm:$0xff]  ;;  %v1854_v16 = vld [vmem:[%s283_s29 + $0x60] sm:$0xff]  ;;  %v1856_v17 = vld [vmem:[%s283_s29 + $0x68] sm:$0xff]  ;;  %v357_v18 = vadd.f32 %v1848_v13, %v1846_v12  ;;  %s1447_s13 = sshll.u32 %s1544_s7, 4  ;;  %s1448_s13 = int_to_ptr.vmem [resolvable:$false] %s1447_s13 }
  0xa3   : > { %v1860_v19 = vld [vmem:[%s283_s29 + $0x70] sm:$0xff]  ;;  %v1862_v20 = vld [vmem:[%s283_s29 + $0x78] sm:$0xff]  ;;  %v360_v21 = vadd.f32 %v1852_v15, %v1850_v14  ;;  %v369_v22 = vadd.f32 %v1856_v17, %v1854_v16  ;;  %v1237_v24 = vld [vmem:[#allocation6 + $0x4] ss:$8 sps:$4 sm:$0xff]   ;;  %p1445_p8 = pnand %p1444_p2, %p1749_p5  ;;  %s1449_s14 = scalar_lea.vmem %s1448_s13, 4096 }
  0xa4   : > { %v372_v23 = vadd.f32 %v1862_v20, %v1860_v19  ;;  %v1239_v25 = vld [vmem:[#allocation6] ss:$8 sps:$4 sm:$0xff]   ;;  %v1240_v26 = vld [vmem:[#allocation6 + $0x14] ss:$8 sps:$4 sm:$0xff]   ;;  %764 = vmatprep.subr.bf16.mxu0 %v1237_v24  ;;  %1096 = vmatprep.subr.bf16.mxu1 %v1237_v24  ;;  %v1242_v27 = vld [vmem:[#allocation6 + $0x10] ss:$8 sps:$4 sm:$0xff]   ;;  %p1450_p3 = scmp.lt.s32.totalorder %s2045_s30, %s1448_s13  ;;  %p1451_p7 = scmp.lt.s32.totalorder %s1449_s14, %s1443_s12 }
  0xa5   : > { %355 = vadd.xlane.f32.xlu0 %v354_v10  ;;  %765 = vmatpush1.bf16.msra.mxu0 %v1239_v25  ;;  %v1243_v28 = vld [vmem:[#allocation6 + $0x24] ss:$8 sps:$4 sm:$0xff]   ;;  %v1245_v29 = vld [vmem:[#allocation6 + $0x20] ss:$8 sps:$4 sm:$0xff]   ;;  %v1246_v30 = vld [vmem:[#allocation6 + $0x34] ss:$8 sps:$4 sm:$0xff]   ;;  %p1446_p10 = pneg %p1445_p8 }
  0xa6   : > { %367 = vadd.xlane.f32.xlu1 %v366_v11  ;;  %1112 = vmatpush1.bf16.msra.mxu1 %v1239_v25  ;;  %v1248_v31 = vld [vmem:[#allocation6 + $0x30] ss:$8 sps:$4 sm:$0xff]   ;;  %v1249_v32 = vld [vmem:[#allocation6 + $0x44] ss:$8 sps:$4 sm:$0xff]   ;;  %v1251_v33 = vld [vmem:[#allocation6 + $0x40] ss:$8 sps:$4 sm:$0xff]   ;;  %p1452_p9 = por %p1451_p7, %p1450_p3 }
  0xa7   : > { %766 = vmatprep.subr.bf16.mxu0 %v1240_v26  ;;  %1097 = vmatprep.subr.bf16.mxu1 %v1240_v26  ;;  %v1252_v34 = vld [vmem:[#allocation6 + $0x54] ss:$8 sps:$4 sm:$0xff]   ;;  %v1254_v35 = vld [vmem:[#allocation6 + $0x50] ss:$8 sps:$4 sm:$0xff]   ;;  %v1255_v36 = vld [vmem:[#allocation6 + $0x64] ss:$8 sps:$4 sm:$0xff]  }
  0xa8   : > { %v1257_v37 = vld [vmem:[#allocation6 + $0x60] ss:$8 sps:$4 sm:$0xff]   ;;  %v1258_v38 = vld [vmem:[#allocation6 + $0x74] ss:$8 sps:$4 sm:$0xff]   ;;  %v1260_v39 = vld [vmem:[#allocation6 + $0x70] ss:$8 sps:$4 sm:$0xff]   ;;  %p1453_p0 = pnand %p1452_p9, %p1446_p10 }
  0xa9   : > { %358 = vadd.xlane.f32.xlu0 %v357_v18  ;;  %767 = vmatpush1.bf16.msra.mxu0 %v1242_v27  ;;  %v1261_v40 = vld [vmem:[#allocation6 + $0x84] ss:$8 sps:$4 sm:$0xff]   ;;  %v1263_v41 = vld [vmem:[#allocation6 + $0x80] ss:$8 sps:$4 sm:$0xff]  }
  0xaa   : > { %361 = vadd.xlane.f32.xlu1 %v360_v21  ;;  %1113 = vmatpush1.bf16.msra.mxu1 %v1242_v27 }
  0xab   : > { %768 = vmatprep.subr.bf16.mxu0 %v1243_v28  ;;  %1098 = vmatprep.subr.bf16.mxu1 %v1243_v28 }
  0xad   : > { %370 = vadd.xlane.f32.xlu0 %v369_v22  ;;  %769 = vmatpush1.bf16.msra.mxu0 %v1245_v29 }
  0xae   : > { %373 = vadd.xlane.f32.xlu1 %v372_v23  ;;  %1114 = vmatpush1.bf16.msra.mxu1 %v1245_v29 }
  0xaf   : > { %770 = vmatprep.subr.bf16.mxu0 %v1246_v30  ;;  %1099 = vmatprep.subr.bf16.mxu1 %v1246_v30 }
  0xb1   : > { %771 = vmatpush1.bf16.msra.mxu0 %v1248_v31 }
  0xb2   : > { %1115 = vmatpush1.bf16.msra.mxu1 %v1248_v31  ;;  %772 = vmatprep.subr.bf16.mxu0 %v1249_v32 }
  0xb3   : > { %1100 = vmatprep.subr.bf16.mxu1 %v1249_v32 }
  0xb5   : > { %773 = vmatpush1.bf16.msra.mxu0 %v1251_v33 }
  0xb6   : > { %1116 = vmatpush1.bf16.msra.mxu1 %v1251_v33  ;;  %774 = vmatprep.subr.bf16.mxu0 %v1252_v34 }
  0xb7   : > { %1101 = vmatprep.subr.bf16.mxu1 %v1252_v34 }
  0xb9   : > { %775 = vmatpush1.bf16.msra.mxu0 %v1254_v35 }
  0xba   : > { %1117 = vmatpush1.bf16.msra.mxu1 %v1254_v35  ;;  %776 = vmatprep.subr.bf16.mxu0 %v1255_v36 }
  0xbb   : > { %1102 = vmatprep.subr.bf16.mxu1 %v1255_v36 }
  0xbd   : > { %777 = vmatpush1.bf16.msra.mxu0 %v1257_v37 }
  0xbe   : > { %1118 = vmatpush1.bf16.msra.mxu1 %v1257_v37  ;;  %778 = vmatprep.subr.bf16.mxu0 %v1258_v38 }
  0xbf   : > { %1103 = vmatprep.subr.bf16.mxu1 %v1258_v38 }
  0xc1   : > { %779 = vmatpush1.bf16.msra.mxu0 %v1260_v39 }
  0xc2   : > { %1119 = vmatpush1.bf16.msra.mxu1 %v1260_v39  ;;  %780 = vmatprep.subr.bf16.mxu0 %v1261_v40 }
  0xc3   : > { %1104 = vmatprep.subr.bf16.mxu1 %v1261_v40 }
  0xc5   : > { %781 = vmatpush1.bf16.msra.mxu0 %v1263_v41 }
  0xc6   : > { %1120 = vmatpush1.bf16.msra.mxu1 %v1263_v41 }
 0x12e   : > { %v353_v42 = vpop.xlane.xlu0 %352 }
 0x12f   : > { %v376_v43 = vmul.f32 0.00390625, %v353_v42  ;;  %v365_v44 = vpop.xlane.xlu1 %364 }
 0x130   : > { %v380_v45 = vmul.f32 0.00390625, %v365_v44 }
 0x131   : > { %v1871_v46 = vsub.f32 %v1822_v0, %v376_v43  ;;  %v1874_v47 = vsub.f32 %v1824_v1, %v376_v43 }
 0x132   : > { %v1877_v48 = vsub.f32 %v1826_v2, %v380_v45  ;;  %v1880_v49 = vsub.f32 %v1830_v4, %v380_v45  ;;  %v356_v50 = vpop.xlane.xlu0 %355 }
 0x133   : > { %v377_v51 = vmul.f32 0.00390625, %v356_v50  ;;  %v368_v52 = vpop.xlane.xlu1 %367  ;;  %v400_v53 = vmul.f32 %v1871_v46, %v1871_v46  ;;  %v401_v54 = vmul.f32 %v1874_v47, %v1874_v47 }
 0x134   : > { %v381_v55 = vmul.f32 0.00390625, %v368_v52  ;;  %v408_v56 = vmul.f32 %v1877_v48, %v1877_v48  ;;  %v409_v57 = vmul.f32 %v1880_v49, %v1880_v49 }
 0x135   : > { %v1891_v58 = vsub.f32 %v1832_v5, %v377_v51  ;;  %v1894_v59 = vsub.f32 %v1834_v6, %v377_v51  ;;  %v416_v60 = vadd.f32 %v401_v54, %v400_v53  ;;  %v1264_v54 = vld [vmem:[#allocation6 + $0x94] ss:$8 sps:$4 sm:$0xff]  }
 0x136   : > { %v1897_v61 = vsub.f32 %v1838_v8, %v381_v55  ;;  %v1900_v62 = vsub.f32 %v1840_v9, %v381_v55  ;;  %v359_v63 = vpop.xlane.xlu0 %358  ;;  %v428_v10 = vadd.f32 %v409_v57, %v408_v56  ;;  %v1266_v55 = vld [vmem:[#allocation6 + $0x90] ss:$8 sps:$4 sm:$0xff]   ;;  %782 = vmatprep.subr.bf16.mxu0 %v1264_v54  ;;  %1105 = vmatprep.subr.bf16.mxu1 %v1264_v54  ;;  %v1267_v56 = vld [vmem:[#allocation6 + $0xa4] ss:$8 sps:$4 sm:$0xff]   ;;  %v1269_v57 = vld [vmem:[#allocation6 + $0xa0] ss:$8 sps:$4 sm:$0xff]  }
 0x137   : > { %v378_v3 = vmul.f32 0.00390625, %v359_v63  ;;  %417 = vadd.xlane.f32.xlu0 %v416_v60  ;;  %v362_v7 = vpop.xlane.xlu1 %361  ;;  %v402_v11 = vmul.f32 %v1891_v58, %v1891_v58  ;;  %v403_v18 = vmul.f32 %v1894_v59, %v1894_v59  ;;  %783 = vmatpush1.bf16.msra.mxu0 %v1266_v55  ;;  %v1270_v60 = vld [vmem:[#allocation6 + $0xb4] ss:$8 sps:$4 sm:$0xff]   ;;  %v1272_v63 = vld [vmem:[#allocation6 + $0xb0] ss:$8 sps:$4 sm:$0xff]  }
 0x138   : > { %v379_v21 = vmul.f32 0.00390625, %v362_v7  ;;  %v410_v22 = vmul.f32 %v1897_v61, %v1897_v61  ;;  %v411_v23 = vmul.f32 %v1900_v62, %v1900_v62  ;;  %1121 = vmatpush1.bf16.msra.mxu1 %v1266_v55  ;;  %784 = vmatprep.subr.bf16.mxu0 %v1267_v56  ;;  %v1275_v7 = vld [vmem:[#allocation6 + $0xc0] ss:$8 sps:$4 sm:$0xff]  }
 0x139   : > { %v1911_v24 = vsub.f32 %v1846_v12, %v378_v3  ;;  %v1914_v25 = vsub.f32 %v1848_v13, %v378_v3  ;;  %v419_v26 = vadd.f32 %v403_v18, %v402_v11  ;;  %1106 = vmatprep.subr.bf16.mxu1 %v1267_v56  ;;  %v1273_v3 = vld [vmem:[#allocation6 + $0xc4] ss:$8 sps:$4 sm:$0xff]   ;;  %v1278_v11 = vld [vmem:[#allocation6 + $0xd0] ss:$8 sps:$4 sm:$0xff]  }
 0x13a   : > { %v1917_v27 = vsub.f32 %v1850_v14, %v379_v21  ;;  %v1920_v28 = vsub.f32 %v1852_v15, %v379_v21  ;;  %v371_v29 = vpop.xlane.xlu0 %370  ;;  %v431_v32 = vadd.f32 %v411_v23, %v410_v22  ;;  %v1279_v18 = vld [vmem:[#allocation6 + $0xe4] ss:$8 sps:$4 sm:$0xff]   ;;  %v1281_v21 = vld [vmem:[#allocation6 + $0xe0] ss:$8 sps:$4 sm:$0xff]   ;;  %v1282_v22 = vld [vmem:[#allocation6 + $0xf4] ss:$8 sps:$4 sm:$0xff]  }
 0x13b   : > { %v382_v30 = vmul.f32 0.00390625, %v371_v29  ;;  %429 = vadd.xlane.f32.xlu0 %v428_v10  ;;  %420 = vadd.xlane.f32.xlu1 %v419_v26  ;;  %v374_v31 = vpop.xlane.xlu1 %373  ;;  %v404_v33 = vmul.f32 %v1911_v24, %v1911_v24  ;;  %v405_v34 = vmul.f32 %v1914_v25, %v1914_v25  ;;  %v1276_v10 = vld [vmem:[#allocation6 + $0xd4] ss:$8 sps:$4 sm:$0xff]   ;;  %v1284_v23 = vld [vmem:[#allocation6 + $0xf0] ss:$8 sps:$4 sm:$0xff]  }
 0x13c   : > { %v383_v35 = vmul.f32 0.00390625, %v374_v31  ;;  %v406_v36 = vmul.f32 %v1917_v27, %v1917_v27  ;;  %v407_v37 = vmul.f32 %v1920_v28, %v1920_v28  ;;  %785 = vmatpush1.bf16.msra.mxu0 %v1269_v57  ;;  %1122 = vmatpush1.bf16.msra.mxu1 %v1269_v57  ;;  %v482_v31 = vlaneseq  ;;  %v480_v57 = vld [vmem:[#allocation9] sm:$0x3] }
 0x13d   : > { %v1931_v38 = vsub.f32 %v1854_v16, %v382_v30  ;;  %v1934_v39 = vsub.f32 %v1856_v17, %v382_v30  ;;  %v422_v40 = vadd.f32 %v405_v34, %v404_v33  ;;  %786 = vmatprep.subr.bf16.mxu0 %v1270_v60  ;;  %1107 = vmatprep.subr.bf16.mxu1 %v1270_v60 }
 0x13e   : > { %v1937_v41 = vsub.f32 %v1860_v19, %v383_v35  ;;  %v1940_v42 = vsub.f32 %v1862_v20, %v383_v35  ;;  %v425_v43 = vadd.f32 %v407_v37, %v406_v36 }
 0x13f   : > { %432 = vadd.xlane.f32.xlu1 %v431_v32  ;;  %423 = vadd.xlane.f32.xlu0 %v422_v40  ;;  %v412_v44 = vmul.f32 %v1931_v38, %v1931_v38  ;;  %v413_v45 = vmul.f32 %v1934_v39, %v1934_v39  ;;  %v483_v40 = vshrl.u32 %v482_v31, 7 }
 0x140   : > { %v414_v50 = vmul.f32 %v1937_v41, %v1937_v41  ;;  %v415_v51 = vmul.f32 %v1940_v42, %v1940_v42  ;;  %787 = vmatpush1.bf16.msra.mxu0 %v1272_v63  ;;  %1123 = vmatpush1.bf16.msra.mxu1 %v1272_v63 }
 0x141   : > { %v434_v52 = vadd.f32 %v413_v45, %v412_v44  ;;  %788 = vmatprep.subr.bf16.mxu0 %v1273_v3  ;;  %1108 = vmatprep.subr.bf16.mxu1 %v1273_v3  ;;  %v1952_v54 = vsub.s32 1, %v483_v40 }
 0x142   : > { %v437_v53 = vadd.f32 %v415_v51, %v414_v50 }
 0x143   : > { %426 = vadd.xlane.f32.xlu1 %v425_v43  ;;  %435 = vadd.xlane.f32.xlu0 %v434_v52 }
 0x144   : > { %789 = vmatpush1.bf16.msra.mxu0 %v1275_v7  ;;  %1124 = vmatpush1.bf16.msra.mxu1 %v1275_v7 }
 0x145   : > { %790 = vmatprep.subr.bf16.mxu0 %v1276_v10  ;;  %1109 = vmatprep.subr.bf16.mxu1 %v1276_v10 }
 0x147   : > { %438 = vadd.xlane.f32.xlu1 %v437_v53  ;;  %v1950_v53 = vsub.s32 0, %v483_v40 }
 0x148   : > { %791 = vmatpush1.bf16.msra.mxu0 %v1278_v11  ;;  %1125 = vmatpush1.bf16.msra.mxu1 %v1278_v11 }
 0x149   : > { %792 = vmatprep.subr.bf16.mxu0 %v1279_v18  ;;  %1110 = vmatprep.subr.bf16.mxu1 %v1279_v18  ;;  %v1955_v11 = vrot.slane %v480_v57, %v1950_v53  ;;  %v1958_v18 = vrot.slane %v480_v57, %v1952_v54 }
 0x14c   : > { %793 = vmatpush1.bf16.msra.mxu0 %v1281_v21  ;;  %1126 = vmatpush1.bf16.msra.mxu1 %v1281_v21  ;;  %v508_v21 = vld [vmem:[#allocation11] sm:$0x3] }
 0x14d   : > { %794 = vmatprep.subr.bf16.mxu0 %v1282_v22  ;;  %1111 = vmatprep.subr.bf16.mxu1 %v1282_v22 }
 0x150   : > { %795 = vmatpush1.bf16.msra.mxu0 %v1284_v23  ;;  %1127 = vmatpush1.bf16.msra.mxu1 %v1284_v23 }
 0x1c4   : > { %v418_v26 = vpop.xlane.xlu0 %417 }
 0x1c5   : > { %v440_v29 = vmul.f32 0.00390625, %v418_v26 }
 0x1c7   : > { %v448_v30 = vadd.f32 1e-05, %v440_v29 }
 0x1c8   : > { %v421_v32 = vpop.xlane.xlu1 %420  ;;  %v430_v33 = vpop.xlane.xlu0 %429 }
 0x1c9   : > { %1285 = vrsqrt.f32 %v448_v30  ;;  %v441_v34 = vmul.f32 0.00390625, %v421_v32  ;;  %v444_v35 = vmul.f32 0.00390625, %v430_v33  ;;  %v1963_v30 = vrot.slane %v508_v21, %v1950_v53 }
 0x1cb   : > { %v449_v36 = vadd.f32 1e-05, %v441_v34  ;;  %v452_v37 = vadd.f32 1e-05, %v444_v35  ;;  %v517_v34 = vrot.slane %v508_v21, %v1952_v54 }
 0x1cc   : > { %v433_v43 = vpop.xlane.xlu1 %432  ;;  %v424_v44 = vpop.xlane.xlu0 %423 }
 0x1cd   : > { %1287 = vrsqrt.f32 %v449_v36  ;;  %v445_v45 = vmul.f32 0.00390625, %v433_v43  ;;  %v442_v50 = vmul.f32 0.00390625, %v424_v44 }
 0x1ce   : > { %1289 = vrsqrt.f32 %v452_v37 }
 0x1cf   : > { %v453_v51 = vadd.f32 1e-05, %v445_v45  ;;  %v450_v52 = vadd.f32 1e-05, %v442_v50 }
 0x1d0   : > { %v427_v55 = vpop.xlane.xlu1 %426  ;;  %v436_v56 = vpop.xlane.xlu0 %435 }
 0x1d1   : > { %1291 = vrsqrt.f32 %v453_v51  ;;  %v443_v60 = vmul.f32 0.00390625, %v427_v55  ;;  %v446_v63 = vmul.f32 0.00390625, %v436_v56 }
 0x1d2   : > { %1293 = vrsqrt.f32 %v450_v52 }
 0x1d3   : > { %v1286_v3 = vpop.eup %1285  ;;  %v451_v7 = vadd.f32 1e-05, %v443_v60  ;;  %v454_v10 = vadd.f32 1e-05, %v446_v63 }
 0x1d4   : > { %v439_v22 = vpop.xlane.xlu1 %438  ;;  %v465_v23 = vmul.f32 %v1286_v3, %v1874_v47  ;;  %v464_v26 = vmul.f32 %v1286_v3, %v1871_v46 }
 0x1d5   : > { %1295 = vrsqrt.f32 %v451_v7  ;;  %v447_v29 = vmul.f32 0.00390625, %v439_v22 }
 0x1d6   : > { %1297 = vrsqrt.f32 %v454_v10  ;;  %v493_v33 = vmul.f32 %v1958_v18, %v465_v23  ;;  %v492_v35 = vmul.f32 %v1955_v11, %v464_v26 }
 0x1d7   : > { %v1288_v31 = vpop.eup %1287  ;;  %v455_v32 = vadd.f32 1e-05, %v447_v29 }
 0x1d8   : > { %v1290_v36 = vpop.eup %1289  ;;  %v467_v37 = vmul.f32 %v1288_v31, %v1894_v59  ;;  %v466_v47 = vmul.f32 %v1288_v31, %v1891_v58  ;;  %v521_v50 = vadd.f32 %v517_v34, %v493_v33  ;;  %v520_v51 = vadd.f32 %v1963_v30, %v492_v35 }
 0x1d9   : > { %1299 = vrsqrt.f32 %v455_v32  ;;  %v473_v46 = vmul.f32 %v1290_v36, %v1880_v49  ;;  %v472_v40 = vmul.f32 %v1290_v36, %v1877_v48 }
 0x1da   : > { %v495_v43 = vmul.f32 %v1958_v18, %v467_v37  ;;  %v494_v44 = vmul.f32 %v1955_v11, %v466_v47 }
 0x1db   : > { %v1292_v45 = vpop.eup %1291  ;;  %v501_v52 = vmul.f32 %v1958_v18, %v473_v46  ;;  %v500_v55 = vmul.f32 %v1955_v11, %v472_v40 }
 0x1dc   : > { %v1294_v59 = vpop.eup %1293  ;;  %v523_v56 = vadd.f32 %v517_v34, %v495_v43  ;;  %v522_v58 = vadd.f32 %v1963_v30, %v494_v44  ;;  %v475_v49 = vmul.f32 %v1292_v45, %v1900_v62  ;;  %v474_v48 = vmul.f32 %v1292_v45, %v1897_v61 }
 0x1dd   : > { %v469_v57 = vmul.f32 %v1294_v59, %v1914_v25  ;;  %v468_v60 = vmul.f32 %v1294_v59, %v1911_v24  ;;  %v529_v22 = vadd.f32 %v517_v34, %v501_v52  ;;  %v528_v23 = vadd.f32 %v1963_v30, %v500_v55 }
 0x1de   : > { %v537_v63 = vpack.c.bf16 %v523_v56, %v521_v50  ;;  %v536_v3 = vpack.c.bf16 %v522_v58, %v520_v51  ;;  %v503_v7 = vmul.f32 %v1958_v18, %v475_v49  ;;  %v502_v10 = vmul.f32 %v1955_v11, %v474_v48 }
 0x1df   : > { %v1296_v21 = vpop.eup %1295  ;;  %v497_v26 = vmul.f32 %v1958_v18, %v469_v57  ;;  %v496_v62 = vmul.f32 %v1955_v11, %v468_v60 }
 0x1e0   : > { %v1298_v29 = vpop.eup %1297  ;;  %796 = vmatprep.mubr.bf16.mxu0 %v537_v63  ;;  %v531_v61 = vadd.f32 %v517_v34, %v503_v7  ;;  %v530_v25 = vadd.f32 %v1963_v30, %v502_v10  ;;  %v471_v24 = vmul.f32 %v1296_v21, %v1920_v28  ;;  %v470_v31 = vmul.f32 %v1296_v21, %v1917_v27 }
 0x1e1   : > { %797 = vmatmul.mubr.bf16.vlgmr.msra.gmra.mrb[0].mxu0 %v536_v3  ;;  %v477_v32 = vmul.f32 %v1298_v29, %v1934_v39  ;;  %v476_v33 = vmul.f32 %v1298_v29, %v1931_v38  ;;  %v525_v40 = vadd.f32 %v517_v34, %v497_v26  ;;  %v524_v43 = vadd.f32 %v1963_v30, %v496_v62 }
 0x1e2   : > { %v541_v35 = vpack.c.bf16 %v531_v61, %v529_v22  ;;  %v540_v36 = vpack.c.bf16 %v530_v25, %v528_v23  ;;  %v499_v37 = vmul.f32 %v1958_v18, %v471_v24  ;;  %v498_v47 = vmul.f32 %v1955_v11, %v470_v31 }
 0x1e3   : > { %v1300_v46 = vpop.eup %1299  ;;  %v505_v44 = vmul.f32 %v1958_v18, %v477_v32  ;;  %v504_v28 = vmul.f32 %v1955_v11, %v476_v33 }
 0x1e4   : > { %816 = vmatprep.mubr.bf16.mxu1 %v541_v35  ;;  %v527_v27 = vadd.f32 %v517_v34, %v499_v37  ;;  %v526_v39 = vadd.f32 %v1963_v30, %v498_v47  ;;  %v479_v38 = vmul.f32 %v1300_v46, %v1940_v42  ;;  %v478_v45 = vmul.f32 %v1300_v46, %v1937_v41  ;;  %v592_v41 = vld [vmem:[#allocation8] sm:$0x3] }
 0x1e5   : > { %817 = vmatmul.mubr.bf16.vlgmr.msra.gmra.mrb[0].mxu1 %v540_v36  ;;  %v533_v59 = vadd.f32 %v517_v34, %v505_v44  ;;  %v532_v58 = vadd.f32 %v1963_v30, %v504_v28  ;;  %v597_v42 = vrot.slane %v592_v41, %v1950_v53 }
 0x1e6   : > { %v539_v50 = vpack.c.bf16 %v527_v27, %v525_v40  ;;  %v538_v51 = vpack.c.bf16 %v526_v39, %v524_v43  ;;  %v507_v52 = vmul.f32 %v1958_v18, %v479_v38  ;;  %v506_v55 = vmul.f32 %v1955_v11, %v478_v45 }
 0x1e7   : > { %v601_v18 = vrot.slane %v592_v41, %v1952_v54 }
 0x1e8   : > { %806 = vmatprep.mubr.bf16.mxu0 %v539_v50  ;;  %v535_v56 = vadd.f32 %v517_v34, %v507_v52  ;;  %v534_v49 = vadd.f32 %v1963_v30, %v506_v55 }
 0x1e9   : > { %807 = vmatmul.mubr.bf16.gmra.mrb[4].mxu0 %v538_v51 }
 0x1ea   : > { %v543_v48 = vpack.c.bf16 %v535_v56, %v533_v59  ;;  %v542_v57 = vpack.c.bf16 %v534_v49, %v532_v58 }
 0x1ec   : > { %826 = vmatprep.mubr.bf16.mxu1 %v543_v48 }
 0x1ed   : > { %827 = vmatmul.mubr.bf16.gmra.mrb[4].mxu1 %v542_v57 }
 0x2b4   : > { %v798_v60 = vpop.f32.mrb[0].mxu0 }
 0x2b5   : > { %v799_v11 = vadd.f32 %v798_v60, %v597_v42  ;;  %v800_v63 = vpop.f32.mrb[1].mxu0 }
 0x2b6   : > { %v801_v3 = vadd.f32 %v800_v63, %v601_v18  ;;  %v802_v34 = vpop.f32.mrb[2].mxu0 }
 0x2b7   : > { %v858_v7 = vadd.f32 %v799_v11, %v1822_v0  ;;  %v803_v10 = vadd.f32 %v802_v34, %v597_v42  ;;  %v804_v30 = vpop.f32.mrb[3].mxu0 }
 0x2b8   : > { %v859_v21 = vadd.f32 %v801_v3, %v1824_v1  ;;  %v805_v22 = vadd.f32 %v804_v30, %v601_v18  ;;  %v818_v23 = vpop.f32.mrb[0].mxu1 }
 0x2b9   : > { %874 = vst [vmem:[%s2010_s26] sm:$0xff] %v858_v7  ;;  %v860_v53 = vadd.f32 %v803_v10, %v1832_v5  ;;  %v819_v54 = vadd.f32 %v818_v23, %v597_v42  ;;  %v820_v26 = vpop.f32.mrb[1].mxu1 }
 0x2ba   : > { %875 = vst [vmem:[%s2010_s26 + $0x8] sm:$0xff] %v859_v21  ;;  %v861_v0 = vadd.f32 %v805_v22, %v1834_v6  ;;  %v821_v1 = vadd.f32 %v820_v26, %v601_v18  ;;  %v822_v62 = vpop.f32.mrb[2].mxu1 }
 0x2bb   : > { %876 = vst [vmem:[%s2010_s26 + $0x10] sm:$0xff] %v860_v53  ;;  %v866_v29 = vadd.f32 %v819_v54, %v1826_v2  ;;  %v823_v61 = vadd.f32 %v822_v62, %v597_v42  ;;  %v824_v25 = vpop.f32.mrb[3].mxu1 }
 0x2bc   : > { %877 = vst [vmem:[%s2010_s26 + $0x18] sm:$0xff] %v861_v0  ;;  %v867_v24 = vadd.f32 %v821_v1, %v1830_v4  ;;  %v825_v31 = vadd.f32 %v824_v25, %v601_v18  ;;  %v808_v5 = vpop.f32.mrb[4].mxu0 }
 0x2bd   : > { %882 = vst [vmem:[%s2010_s26 + $0x40] sm:$0xff] %v866_v29  ;;  %v868_v32 = vadd.f32 %v823_v61, %v1838_v8  ;;  %v809_v33 = vadd.f32 %v808_v5, %v597_v42  ;;  %v810_v6 = vpop.f32.mrb[5].mxu0 }
 0x2be   : > { %883 = vst [vmem:[%s2010_s26 + $0x48] sm:$0xff] %v867_v24  ;;  %v869_v35 = vadd.f32 %v825_v31, %v1840_v9  ;;  %v811_v36 = vadd.f32 %v810_v6, %v601_v18  ;;  %v812_v2 = vpop.f32.mrb[6].mxu0 }
 0x2bf   : > { %884 = vst [vmem:[%s2010_s26 + $0x50] sm:$0xff] %v868_v32  ;;  %v862_v37 = vadd.f32 %v809_v33, %v1846_v12  ;;  %v813_v4 = vadd.f32 %v812_v2, %v597_v42  ;;  %v814_v47 = vpop.f32.mrb[7].mxu0 }
 0x2c0   : > { %885 = vst [vmem:[%s2010_s26 + $0x58] sm:$0xff] %v869_v35  ;;  %v863_v46 = vadd.f32 %v811_v36, %v1848_v13  ;;  %v815_v8 = vadd.f32 %v814_v47, %v601_v18  ;;  %v828_v40 = vpop.f32.mrb[4].mxu1 }
 0x2c1   : > { %878 = vst [vmem:[%s2010_s26 + $0x20] sm:$0xff] %v862_v37  ;;  %v864_v43 = vadd.f32 %v813_v4, %v1850_v14  ;;  %v829_v9 = vadd.f32 %v828_v40, %v597_v42  ;;  %v830_v44 = vpop.f32.mrb[5].mxu1 }
 0x2c2   : > { %879 = vst [vmem:[%s2010_s26 + $0x28] sm:$0xff] %v863_v46  ;;  %v865_v28 = vadd.f32 %v815_v8, %v1852_v15  ;;  %v831_v12 = vadd.f32 %v830_v44, %v601_v18  ;;  %v832_v27 = vpop.f32.mrb[6].mxu1 }
 0x2c3   : > { %880 = vst [vmem:[%s2010_s26 + $0x30] sm:$0xff] %v864_v43  ;;  %v870_v13 = vadd.f32 %v829_v9, %v1854_v16  ;;  %v833_v39 = vadd.f32 %v832_v27, %v597_v42  ;;  %v834_v14 = vpop.f32.mrb[7].mxu1 }
 0x2c4   : > { %881 = vst [vmem:[%s2010_s26 + $0x38] sm:$0xff] %v865_v28  ;;  %v871_v38 = vadd.f32 %v831_v12, %v1856_v17  ;;  %v835_v45 = vadd.f32 %v834_v14, %v601_v18 }
 0x2c5   : > { %886 = vst [vmem:[%s2010_s26 + $0x60] sm:$0xff] %v870_v13  ;;  %v872_v15 = vadd.f32 %v833_v39, %v1860_v19 }
 0x2c6   : > { %887 = vst [vmem:[%s2010_s26 + $0x68] sm:$0xff] %v871_v38  ;;  %v873_v16 = vadd.f32 %v835_v45, %v1862_v20 }
 0x2c7   : > { %888 = vst [vmem:[%s2010_s26 + $0x70] sm:$0xff] %v872_v15 }
 0x2c8   : > { %889 = vst [vmem:[%s2010_s26 + $0x78] sm:$0xff] %v873_v16 }
 0x2c9   : > { %1456 = shalt.err (!%p1453_p0)
}
 0x2ca   : > { %s1457_s27 = scalar_lea.hbm %s2043_s21, 2048  ;;  %s1461_s9 = scalar_lea.hbm %s2103_s5, 4096 }
 0x2cb   : > { %p1458_p4 = scmp.ne.s32.totalorder %s2043_s21, %s1457_s27  ;;  %p1462_p12 = scmp.lt.u32.totalorder %s2043_s21, %s2103_s5 }
 0x2cc   : > { %p1463_p1 = scmp.lt.u32.totalorder %s1461_s9, %s1457_s27  ;;  %p1465_p2 = scmp.lt.u32.totalorder %s1457_s27, %s2043_s21 }
 0x2cd   : > { %p1459_p13 = pnand %p1458_p4, %p1749_p5 }
 0x2ce   : > { %p1464_p11 = por %p1463_p1, %p1462_p12 }
 0x2cf   : > { %p1460_p6 = pneg %p1459_p13 }
 0x2d0   : > { %p1466_p8 = por %p1465_p2, %p1464_p11 }
 0x2d2   : > { %p1467_p10 = pnand %p1466_p8, %p1460_p6 }
 0x2d4   : > { %1470 = shalt.err (!%p1467_p10)
}
 0x2d5   : > { %s1545_s26 = smov 256   ;;  %s1546_s28 = smov 16  }
 0x2d6   : > { %1146 = dma.vmem_to_hbm [thread:$0]  (%p1749_p5), %s2045_s30, 2048, %s2043_s21, %s891_s17, %s1545_s26, %s1545_s26, %s1546_s28  }
 0x2d7 PF: > { %s2125_s15 = sld [smem:[#allocation17_spill]]  ;;  %s2126_s16 = sld [smem:[#allocation18_spill]] }
 0x2d8   : > { %p2128_p7 = scmp.ge.s32.totalorder %s1533_s23, 2 }
 0x2dd   : > { %s922_s12 = sand.u32 1, %s2125_s15   ;;  %p2127_p3 = scmp.ne.s32.totalorder %s2126_s16, 0 }
 0x2de   : > { %s923_s7 = scalar_lea.sflag [#allocation5], %s922_s12 }
 0x2df   : > { %p1166_p9 = pnand %p2128_p7, %p2127_p3 }
 0x2e1   : > { %1508 = dma.done.wait (!%p1166_p9), %s923_s7, 2048  }
 0x2e2   : > { %1510 = vsyncadd (!%p1166_p9), %s923_s7, 4294965248  ;;  %s23_s23 = sadd.s32 1, %s1533_s23   ;;  %s2129_s18 = smov %s1517_s19 }
 0x2e3   : > { %p20_p0 = scmp.ge.s32.totalorder %s23_s23, 4   ;;  %s2130_s19 = smov %s1521_s20 }
 0x2e4   : > { %s2131_s20 = smov %s1758_s11  ;;  %s2132_s21 = smov %s1529_s22 }
 0x2e5   : > { %s2133_s22 = smov %s2135_s24  ;;  %22 = sbr.rel (!%p20_p0) target bundleno = 8 (0x8), region = 108 }
 0x2ec   :  { %928 = vsyncpa [#allocation4], 1 }
 0x2ed   :  { %930 = vsyncpa [#allocation4 + $0x1], 1 }
 0x2ee   :  { %931 = vsyncpa [#allocation7], 1 }
 0x2ef   :  { %932 = vsyncpa [#allocation10], 1 }
 0x2f0   :  { %933 = vsyncpa [#allocation5], 1 }
 0x2f1   :  { %935 = vsyncpa [#allocation5 + $0x1], 1 }

</bundles_post_ra>
